<compile_context>
chip_gen: v7x
topology: tpu7x:2x2x1
jax: 0.10.0
libtpu: 0.0.40
codegen_flags: <defaults>
</compile_context>

<pallas_src>
import jax
import jax.numpy as jnp
from jax.experimental import pallas as pl
from jax.experimental.pallas import tpu as pltpu


def basic_block_kernel(x_ref, w1_ref, w2_ref, s1_ref, b1_ref, s2_ref, b2_ref,
                       out_ref, rp_ref):
    # x_ref  : (B, H, W*C)   bf16, lane-dense activations for B images
    # w*_ref : (K, W*C)      bf16, block-Toeplitz conv weights, K = 3*W*C
    # s*/b*  : (1, W*C)      f32, folded BN scale/shift tiled over W
    # out_ref: (B, H, W*C)   bf16, lane-dense output
    # rp_ref : (B, H, K)     bf16 scratch, row-patch (im2col over rows only)
    B, H, WC = x_ref.shape
    K = rp_ref.shape[2]
    Kseg = K // 3                 # == W*C  (identity shortcut => Cin == Cout)
    M = B * H

    # Zero ONLY the two height-halo regions (lane-aligned, full 128-wide
    # stores at offsets 0 and 2*Kseg).  NOTE: build_rowpatch's h0/h1 trimming
    # never writes rp row 0 of the dh=0 segment nor row H-1 of the dh=2
    # segment, so this single zeroing per grid step keeps BOTH convs correct.
    zrow = jnp.zeros((B, 1, Kseg), rp_ref.dtype)
    rp_ref[:, 0:1, 0:Kseg] = zrow                        # top halo    (dh = 0)
    rp_ref[:, H - 1:H, 2 * Kseg:3 * Kseg] = zrow         # bottom halo (dh = 2)

    def build_rowpatch(src_bf16):
        # Row-patch row (b, h) holds input rows {h-1, h, h+1} back-to-back;
        # a 3x3 SAME conv then becomes ONE MXU matmul vs. the banded weight.
        for dh in range(3):
            dy = dh - 1
            h0, h1 = max(0, -dy), H - max(0, dy)
            seg = dh * Kseg
            rp_ref[:, h0:h1, seg:seg + Kseg] = src_bf16[:, h0 + dy:h1 + dy, :]

    def conv(w_ref):
        patch = rp_ref[...].reshape(M, K)                # bf16, no cast pass
        return jnp.dot(patch, w_ref[...], preferred_element_type=jnp.float32)

    # ---- conv1 -> bn1 -> relu (epilogue in f32) ------------------------------
    build_rowpatch(x_ref[...])
    out1 = jnp.maximum(conv(w1_ref) * s1_ref[...] + b1_ref[...], 0.0)  # (M, WC)

    # ---- conv2 -> bn2 --------------------------------------------------------
    build_rowpatch(out1.astype(jnp.bfloat16).reshape(B, H, WC))
    out2 = conv(w2_ref) * s2_ref[...] + b2_ref[...]

    # ---- identity shortcut + final relu, bf16 lane-dense store ---------------
    sc = x_ref[...].astype(jnp.float32).reshape(M, WC)
    out_ref[...] = jnp.maximum(out2 + sc, 0.0).reshape(B, H, WC).astype(out_ref.dtype)


def _banded_conv_weight(w_hwio, width):
    """(3, 3, Cin, Cout) HWIO -> block-Toeplitz (3*width*Cin, width*Cout).

    No width halo: row index = dh*width*Cin + wp*Cin + ci with wp indexing the
    UNPADDED input width; col index = w*Cout + co.  Entry is
    w_hwio[dh, wp - w + 1, ci, co] when 0 <= wp - w + 1 < 3, else 0; width
    zero-padding is expressed purely by the band structure, so K = 3*W*Cin
    tiles the MXU exactly (384 = 3x128 in the test) with lane-aligned patches.
    """
    kh, kw, cin, cout = w_hwio.shape
    segs = []
    for dh in range(kh):
        seg = jnp.zeros((width, cin, width, cout), w_hwio.dtype)
        for dw in range(kw):
            # Output position w reads input position wp = w + dw - 1; keep only
            # in-range pairs (out-of-range => implicit zero padding).
            ws = [w for w in range(width) if 0 <= w + dw - 1 < width]
            wps = [w + dw - 1 for w in ws]
            upd = jnp.broadcast_to(w_hwio[dh, dw], (len(ws), cin, cout))
            seg = seg.at[jnp.array(wps), :, jnp.array(ws), :].set(upd)
        segs.append(seg.reshape(width * cin, width * cout))
    return jnp.concatenate(segs, axis=0)


def prepare_params(w1, w2, s1, b1, s2, b2, width):
    """Build banded conv weights and lane-tiled BN params ONCE per layer
    (hoisted out of the per-forward path)."""
    cout = w1.shape[-1]
    wc = width * cout
    w1b = _banded_conv_weight(w1.astype(jnp.float32), width).astype(jnp.bfloat16)
    w2b = _banded_conv_weight(w2.astype(jnp.float32), width).astype(jnp.bfloat16)
    s1t = jnp.tile(s1.astype(jnp.float32), width).reshape(1, wc)
    b1t = jnp.tile(b1.astype(jnp.float32), width).reshape(1, wc)
    s2t = jnp.tile(s2.astype(jnp.float32), width).reshape(1, wc)
    b2t = jnp.tile(b2.astype(jnp.float32), width).reshape(1, wc)
    return w1b, w2b, s1t, b1t, s2t, b2t


def _pick_batch_block(n, h, target_rows=256):
    """Smallest divisor of n whose block gives M = d*h >= target_rows (fills a
    256-wide MXU M dim and keeps >1 grid step when the batch allows); falls
    back to a single grid step.  Always divides n (fixes the odd-N assert)."""
    for d in range(1, n + 1):
        if n % d == 0 and d * h >= target_rows:
            return d
    return n


def basic_block_forward_lane_dense(x, params, *, batch_block=None):
    """x: (N, H, W*C) bf16 lane-dense activations; returns same shape, bf16."""
    w1b, w2b, s1t, b1t, s2t, b2t = params
    N, H, WC = x.shape
    K = w1b.shape[0]
    assert K == 3 * WC, "identity shortcut requires in_planes == planes"
    assert H >= 2
    if batch_block is None:
        batch_block = _pick_batch_block(N, H)
    assert N % batch_block == 0

    return pl.pallas_call(
        basic_block_kernel,
        out_shape=jax.ShapeDtypeStruct((N, H, WC), jnp.bfloat16),
        grid_spec=pltpu.PrefetchScalarGridSpec(
            num_scalar_prefetch=0,
            grid=(N // batch_block,),
            in_specs=[
                pl.BlockSpec((batch_block, H, WC), lambda n: (n, 0, 0)),
                pl.BlockSpec((K, WC), lambda n: (0, 0)),
                pl.BlockSpec((K, WC), lambda n: (0, 0)),
                pl.BlockSpec((1, WC), lambda n: (0, 0)),
                pl.BlockSpec((1, WC), lambda n: (0, 0)),
                pl.BlockSpec((1, WC), lambda n: (0, 0)),
                pl.BlockSpec((1, WC), lambda n: (0, 0)),
            ],
            out_specs=pl.BlockSpec((batch_block, H, WC), lambda n: (n, 0, 0)),
            # bf16 row-patch scratch: half the VMEM / vld-vst traffic of f32.
            scratch_shapes=[pltpu.VMEM((batch_block, H, K), jnp.bfloat16)],
        ),
        compiler_params=pltpu.CompilerParams(
            dimension_semantics=("parallel",)),
    )(x, w1b, w2b, s1t, b1t, s2t, b2t)


def basic_block_forward(x_nchw, params):
    """NCHW interop wrapper (test only).  In a full NHWC/lane-dense ResNet the
    boundary transposes below disappear and activations stay bf16 between
    blocks."""
    N, C, H, W = x_nchw.shape
    x = jnp.transpose(x_nchw, (0, 2, 3, 1)).reshape(N, H, W * C).astype(jnp.bfloat16)
    out = basic_block_forward_lane_dense(x, params)
    return jnp.transpose(out.reshape(N, H, W, C), (0, 3, 1, 2))


def reference_forward(x_nchw, w1, w2, s1, b1, s2, b2):
    """Pure-JAX reference with matching precision (bf16 operands, f32 acc)."""
    x = jnp.transpose(x_nchw, (0, 2, 3, 1)).astype(jnp.bfloat16)
    dn = jax.lax.conv_dimension_numbers(x.shape, w1.shape,
                                        ('NHWC', 'HWIO', 'NHWC'))
    c1 = jax.lax.conv_general_dilated(x, w1.astype(jnp.bfloat16), (1, 1), 'SAME',
                                      dimension_numbers=dn,
                                      preferred_element_type=jnp.float32)
    o1 = jnp.maximum(c1 * s1.reshape(1, 1, 1, -1) + b1.reshape(1, 1, 1, -1), 0.0)
    c2 = jax.lax.conv_general_dilated(o1.astype(jnp.bfloat16),
                                      w2.astype(jnp.bfloat16), (1, 1), 'SAME',
                                      dimension_numbers=dn,
                                      preferred_element_type=jnp.float32)
    o2 = c2 * s2.reshape(1, 1, 1, -1) + b2.reshape(1, 1, 1, -1)
    out = jnp.maximum(o2 + x.astype(jnp.float32), 0.0)
    return jnp.transpose(out, (0, 3, 1, 2))


if __name__ == "__main__":
    key = jax.random.PRNGKey(0)
    N, C, H, W = 8, 8, 16, 16        # in_planes == planes == 8, stride == 1; W*C == 128
    eps = 1e-5

    keys = jax.random.split(key, 11)
    x = jax.random.normal(keys[0], (N, C, H, W), jnp.float32)

    # conv weights in HWIO layout (3, 3, Cin, Cout)
    w1 = 0.1 * jax.random.normal(keys[1], (3, 3, C, C), jnp.float32)
    w2 = 0.1 * jax.random.normal(keys[2], (3, 3, C, C), jnp.float32)

    # BatchNorm parameters (deterministic synthetic values), folded to scale/shift
    gamma1 = 1.0 + 0.1 * jax.random.normal(keys[3], (C,), jnp.float32)
    beta1 = 0.1 * jax.random.normal(keys[4], (C,), jnp.float32)
    mean1 = 0.1 * jax.random.normal(keys[5], (C,), jnp.float32)
    var1 = 0.5 + jnp.abs(jax.random.normal(keys[6], (C,), jnp.float32))
    gamma2 = 1.0 + 0.1 * jax.random.normal(keys[7], (C,), jnp.float32)
    beta2 = 0.1 * jax.random.normal(keys[8], (C,), jnp.float32)
    mean2 = 0.1 * jax.random.normal(keys[9], (C,), jnp.float32)
    var2 = 0.5 + jnp.abs(jax.random.normal(keys[10], (C,), jnp.float32))

    s1 = gamma1 / jnp.sqrt(var1 + eps)
    b1 = beta1 - mean1 * s1
    s2 = gamma2 / jnp.sqrt(var2 + eps)
    b2 = beta2 - mean2 * s2

    # Hoisted, per-layer one-time preprocessing (banded weights + tiled BN).
    params = prepare_params(w1, w2, s1, b1, s2, b2, W)

    out = basic_block_forward(x, params)
    out = jax.block_until_ready(out)

    ref = reference_forward(x, w1, w2, s1, b1, s2, b2)
    assert out.shape == (N, C, H, W)
    out_f32 = out.astype(jnp.float32)
    max_diff = jnp.max(jnp.abs(out_f32 - ref))
    assert jnp.allclose(out_f32, ref, atol=2e-2, rtol=2e-2), \
        f"max abs diff = {max_diff}"

    print("KERNEL_OK")
</pallas_src>

<mosaic_0001>
module attributes {stable_mosaic.version = 11 : i64} {
  func.func @basic_block_kernel(%arg0: i32, %arg1: memref<8x16x128xbf16, #tpu.memory_space<vmem>>, %arg2: memref<384x128xbf16, #tpu.memory_space<vmem>>, %arg3: memref<384x128xbf16, #tpu.memory_space<vmem>>, %arg4: memref<1x128xf32, #tpu.memory_space<vmem>>, %arg5: memref<1x128xf32, #tpu.memory_space<vmem>>, %arg6: memref<1x128xf32, #tpu.memory_space<vmem>>, %arg7: memref<1x128xf32, #tpu.memory_space<vmem>>, %arg8: memref<8x16x128xbf16, #tpu.memory_space<vmem>>, %arg9: memref<8x16x384xbf16, #tpu.memory_space<vmem>>) attributes {dimension_semantics = [#tpu.dimension_semantics<parallel>], iteration_bounds = array<i64: 1>, scalar_prefetch = 0 : i64, scratch_operands = 1 : i64, tpu.core_type = #tpu.core_type<tc>, window_params = [{transform_indices = @transform_0, window_bounds = array<i64: 8, 16, 128>}, {pipeline_mode = #tpu.pipeline_mode<synchronous>, transform_indices = @transform_1, window_bounds = array<i64: 384, 128>}, {pipeline_mode = #tpu.pipeline_mode<synchronous>, transform_indices = @transform_2, window_bounds = array<i64: 384, 128>}, {pipeline_mode = #tpu.pipeline_mode<synchronous>, transform_indices = @transform_3, window_bounds = array<i64: 1, 128>}, {pipeline_mode = #tpu.pipeline_mode<synchronous>, transform_indices = @transform_4, window_bounds = array<i64: 1, 128>}, {pipeline_mode = #tpu.pipeline_mode<synchronous>, transform_indices = @transform_5, window_bounds = array<i64: 1, 128>}, {pipeline_mode = #tpu.pipeline_mode<synchronous>, transform_indices = @transform_6, window_bounds = array<i64: 1, 128>}, {transform_indices = @transform_7, window_bounds = array<i64: 8, 16, 128>}]} {
    %cst = arith.constant 0.000000e+00 : bf16
    %0 = vector.broadcast %cst : bf16 to vector<8x1x128xbf16>
    %c0 = arith.constant 0 : index
    %c0_0 = arith.constant 0 : index
    %c0_1 = arith.constant 0 : index
    %1 = vector.load %arg9[%c0, %c0_0, %c0_1] : memref<8x16x384xbf16, #tpu.memory_space<vmem>>, vector<8x1x128xbf16>
    tpu.vector_store %arg9[%c0, %c0_0, %c0_1], %0 {strides = array<i32>} : memref<8x16x384xbf16, #tpu.memory_space<vmem>>, vector<8x1x128xbf16>,
    %c0_2 = arith.constant 0 : index
    %c15 = arith.constant 15 : index
    %c256 = arith.constant 256 : index
    %2 = vector.load %arg9[%c0_2, %c15, %c256] : memref<8x16x384xbf16, #tpu.memory_space<vmem>>, vector<8x1x128xbf16>
    tpu.vector_store %arg9[%c0_2, %c15, %c256], %0 {strides = array<i32>} : memref<8x16x384xbf16, #tpu.memory_space<vmem>>, vector<8x1x128xbf16>,
    %c0_3 = arith.constant 0 : index
    %c0_4 = arith.constant 0 : index
    %c0_5 = arith.constant 0 : index
    %3 = vector.load %arg1[%c0_3, %c0_4, %c0_5] : memref<8x16x128xbf16, #tpu.memory_space<vmem>>, vector<8x16x128xbf16>
    %4 = vector.extract_strided_slice %3 {offsets = [0, 0, 0], sizes = [8, 15, 128], strides = [1, 1, 1]} : vector<8x16x128xbf16> to vector<8x15x128xbf16>
    %c0_6 = arith.constant 0 : index
    %c1 = arith.constant 1 : index
    %c0_7 = arith.constant 0 : index
    %5 = vector.load %arg9[%c0_6, %c1, %c0_7] : memref<8x16x384xbf16, #tpu.memory_space<vmem>>, vector<8x15x128xbf16>
    tpu.vector_store %arg9[%c0_6, %c1, %c0_7], %4 {strides = array<i32>} : memref<8x16x384xbf16, #tpu.memory_space<vmem>>, vector<8x15x128xbf16>,
    %c0_8 = arith.constant 0 : index
    %c0_9 = arith.constant 0 : index
    %c128 = arith.constant 128 : index
    %6 = vector.load %arg9[%c0_8, %c0_9, %c128] : memref<8x16x384xbf16, #tpu.memory_space<vmem>>, vector<8x16x128xbf16>
    tpu.vector_store %arg9[%c0_8, %c0_9, %c128], %3 {strides = array<i32>} : memref<8x16x384xbf16, #tpu.memory_space<vmem>>, vector<8x16x128xbf16>,
    %7 = vector.extract_strided_slice %3 {offsets = [0, 1, 0], sizes = [8, 15, 128], strides = [1, 1, 1]} : vector<8x16x128xbf16> to vector<8x15x128xbf16>
    %c0_10 = arith.constant 0 : index
    %c0_11 = arith.constant 0 : index
    %c256_12 = arith.constant 256 : index
    %8 = vector.load %arg9[%c0_10, %c0_11, %c256_12] : memref<8x16x384xbf16, #tpu.memory_space<vmem>>, vector<8x15x128xbf16>
    tpu.vector_store %arg9[%c0_10, %c0_11, %c256_12], %7 {strides = array<i32>} : memref<8x16x384xbf16, #tpu.memory_space<vmem>>, vector<8x15x128xbf16>,
    %c0_13 = arith.constant 0 : index
    %c0_14 = arith.constant 0 : index
    %c0_15 = arith.constant 0 : index
    %9 = vector.load %arg9[%c0_13, %c0_14, %c0_15] : memref<8x16x384xbf16, #tpu.memory_space<vmem>>, vector<8x16x384xbf16>
    %10 = vector.shape_cast %9 : vector<8x16x384xbf16> to vector<128x384xbf16>
    %c0_16 = arith.constant 0 : index
    %c0_17 = arith.constant 0 : index
    %11 = vector.load %arg2[%c0_16, %c0_17] : memref<384x128xbf16, #tpu.memory_space<vmem>>, vector<384x128xbf16>
    %cst_18 = arith.constant dense<0.000000e+00> : vector<128x128xf32>
    %12 = tpu.matmul %10, %11, %cst_18 {dimension_numbers = #tpu.dot_dimension_numbers<[1], [0], [0], [1], [0, 0, 1, 1], [], []>} : vector<128x384xbf16>, vector<384x128xbf16>, vector<128x128xf32> -> vector<128x128xf32>
    %c0_19 = arith.constant 0 : index
    %c0_20 = arith.constant 0 : index
    %13 = vector.load %arg4[%c0_19, %c0_20] : memref<1x128xf32, #tpu.memory_space<vmem>>, vector<1x128xf32>
    %14 = vector.broadcast %13 : vector<1x128xf32> to vector<128x128xf32>
    %15 = arith.mulf %12, %14 : vector<128x128xf32>
    %c0_21 = arith.constant 0 : index
    %c0_22 = arith.constant 0 : index
    %16 = vector.load %arg5[%c0_21, %c0_22] : memref<1x128xf32, #tpu.memory_space<vmem>>, vector<1x128xf32>
    %17 = vector.broadcast %16 : vector<1x128xf32> to vector<128x128xf32>
    %18 = arith.addf %15, %17 : vector<128x128xf32>
    %cst_23 = arith.constant 0.000000e+00 : f32
    %19 = vector.broadcast %cst_23 : f32 to vector<128x128xf32>
    %20 = arith.maximumf %18, %19 : vector<128x128xf32>
    %21 = arith.truncf %20 : vector<128x128xf32> to vector<128x128xbf16>
    %22 = vector.shape_cast %21 : vector<128x128xbf16> to vector<8x16x128xbf16>
    %23 = vector.extract_strided_slice %22 {offsets = [0, 0, 0], sizes = [8, 15, 128], strides = [1, 1, 1]} : vector<8x16x128xbf16> to vector<8x15x128xbf16>
    %c0_24 = arith.constant 0 : index
    %c1_25 = arith.constant 1 : index
    %c0_26 = arith.constant 0 : index
    %24 = vector.load %arg9[%c0_24, %c1_25, %c0_26] : memref<8x16x384xbf16, #tpu.memory_space<vmem>>, vector<8x15x128xbf16>
    tpu.vector_store %arg9[%c0_24, %c1_25, %c0_26], %23 {strides = array<i32>} : memref<8x16x384xbf16, #tpu.memory_space<vmem>>, vector<8x15x128xbf16>,
    %c0_27 = arith.constant 0 : index
    %c0_28 = arith.constant 0 : index
    %c128_29 = arith.constant 128 : index
    %25 = vector.load %arg9[%c0_27, %c0_28, %c128_29] : memref<8x16x384xbf16, #tpu.memory_space<vmem>>, vector<8x16x128xbf16>
    tpu.vector_store %arg9[%c0_27, %c0_28, %c128_29], %22 {strides = array<i32>} : memref<8x16x384xbf16, #tpu.memory_space<vmem>>, vector<8x16x128xbf16>,
    %26 = vector.extract_strided_slice %22 {offsets = [0, 1, 0], sizes = [8, 15, 128], strides = [1, 1, 1]} : vector<8x16x128xbf16> to vector<8x15x128xbf16>
    %c0_30 = arith.constant 0 : index
    %c0_31 = arith.constant 0 : index
    %c256_32 = arith.constant 256 : index
    %27 = vector.load %arg9[%c0_30, %c0_31, %c256_32] : memref<8x16x384xbf16, #tpu.memory_space<vmem>>, vector<8x15x128xbf16>
    tpu.vector_store %arg9[%c0_30, %c0_31, %c256_32], %26 {strides = array<i32>} : memref<8x16x384xbf16, #tpu.memory_space<vmem>>, vector<8x15x128xbf16>,
    %c0_33 = arith.constant 0 : index
    %c0_34 = arith.constant 0 : index
    %c0_35 = arith.constant 0 : index
    %28 = vector.load %arg9[%c0_33, %c0_34, %c0_35] : memref<8x16x384xbf16, #tpu.memory_space<vmem>>, vector<8x16x384xbf16>
    %29 = vector.shape_cast %28 : vector<8x16x384xbf16> to vector<128x384xbf16>
    %c0_36 = arith.constant 0 : index
    %c0_37 = arith.constant 0 : index
    %30 = vector.load %arg3[%c0_36, %c0_37] : memref<384x128xbf16, #tpu.memory_space<vmem>>, vector<384x128xbf16>
    %cst_38 = arith.constant dense<0.000000e+00> : vector<128x128xf32>
    %31 = tpu.matmul %29, %30, %cst_38 {dimension_numbers = #tpu.dot_dimension_numbers<[1], [0], [0], [1], [0, 0, 1, 1], [], []>} : vector<128x384xbf16>, vector<384x128xbf16>, vector<128x128xf32> -> vector<128x128xf32>
    %c0_39 = arith.constant 0 : index
    %c0_40 = arith.constant 0 : index
    %32 = vector.load %arg6[%c0_39, %c0_40] : memref<1x128xf32, #tpu.memory_space<vmem>>, vector<1x128xf32>
    %33 = vector.broadcast %32 : vector<1x128xf32> to vector<128x128xf32>
    %34 = arith.mulf %31, %33 : vector<128x128xf32>
    %c0_41 = arith.constant 0 : index
    %c0_42 = arith.constant 0 : index
    %35 = vector.load %arg7[%c0_41, %c0_42] : memref<1x128xf32, #tpu.memory_space<vmem>>, vector<1x128xf32>
    %36 = vector.broadcast %35 : vector<1x128xf32> to vector<128x128xf32>
    %37 = arith.addf %34, %36 : vector<128x128xf32>
    %c0_43 = arith.constant 0 : index
    %c0_44 = arith.constant 0 : index
    %c0_45 = arith.constant 0 : index
    %38 = vector.load %arg1[%c0_43, %c0_44, %c0_45] : memref<8x16x128xbf16, #tpu.memory_space<vmem>>, vector<8x16x128xbf16>
    %39 = arith.extf %38 : vector<8x16x128xbf16> to vector<8x16x128xf32>
    %40 = vector.shape_cast %39 : vector<8x16x128xf32> to vector<128x128xf32>
    %41 = arith.addf %37, %40 : vector<128x128xf32>
    %cst_46 = arith.constant 0.000000e+00 : f32
    %42 = vector.broadcast %cst_46 : f32 to vector<128x128xf32>
    %43 = arith.maximumf %41, %42 : vector<128x128xf32>
    %44 = vector.shape_cast %43 : vector<128x128xf32> to vector<8x16x128xf32>
    %45 = arith.truncf %44 : vector<8x16x128xf32> to vector<8x16x128xbf16>
    %c0_47 = arith.constant 0 : index
    %c0_48 = arith.constant 0 : index
    %c0_49 = arith.constant 0 : index
    %46 = vector.load %arg8[%c0_47, %c0_48, %c0_49] : memref<8x16x128xbf16, #tpu.memory_space<vmem>>, vector<8x16x128xbf16>
    tpu.vector_store %arg8[%c0_47, %c0_48, %c0_49], %45 {strides = array<i32>} : memref<8x16x128xbf16, #tpu.memory_space<vmem>>, vector<8x16x128xbf16>,
    return
  }
  func.func @transform_0(%arg0: i32) -> (i32, i32, i32) {
    %c0_i32 = arith.constant 0 : i32
    %c0_i32_0 = arith.constant 0 : i32
    %c0_i32_1 = arith.constant 0 : i32
    return %arg0, %c0_i32, %c0_i32_0 : i32, i32, i32
  }
  func.func @transform_1(%arg0: i32) -> (i32, i32) {
    %c0_i32 = arith.constant 0 : i32
    %c0_i32_0 = arith.constant 0 : i32
    %c0_i32_1 = arith.constant 0 : i32
    return %c0_i32, %c0_i32_0 : i32, i32
  }
  func.func @transform_2(%arg0: i32) -> (i32, i32) {
    %c0_i32 = arith.constant 0 : i32
    %c0_i32_0 = arith.constant 0 : i32
    %c0_i32_1 = arith.constant 0 : i32
    return %c0_i32, %c0_i32_0 : i32, i32
  }
  func.func @transform_3(%arg0: i32) -> (i32, i32) {
    %c0_i32 = arith.constant 0 : i32
    %c0_i32_0 = arith.constant 0 : i32
    %c0_i32_1 = arith.constant 0 : i32
    return %c0_i32, %c0_i32_0 : i32, i32
  }
  func.func @transform_4(%arg0: i32) -> (i32, i32) {
    %c0_i32 = arith.constant 0 : i32
    %c0_i32_0 = arith.constant 0 : i32
    %c0_i32_1 = arith.constant 0 : i32
    return %c0_i32, %c0_i32_0 : i32, i32
  }
  func.func @transform_5(%arg0: i32) -> (i32, i32) {
    %c0_i32 = arith.constant 0 : i32
    %c0_i32_0 = arith.constant 0 : i32
    %c0_i32_1 = arith.constant 0 : i32
    return %c0_i32, %c0_i32_0 : i32, i32
  }
  func.func @transform_6(%arg0: i32) -> (i32, i32) {
    %c0_i32 = arith.constant 0 : i32
    %c0_i32_0 = arith.constant 0 : i32
    %c0_i32_1 = arith.constant 0 : i32
    return %c0_i32, %c0_i32_0 : i32, i32
  }
  func.func @transform_7(%arg0: i32) -> (i32, i32, i32) {
    %c0_i32 = arith.constant 0 : i32
    %c0_i32_0 = arith.constant 0 : i32
    %c0_i32_1 = arith.constant 0 : i32
    return %arg0, %c0_i32, %c0_i32_0 : i32, i32, i32
  }
}

</mosaic_0001>

<bundles_post_ra>
// kernel: tpu_custom_call.1
= control target key start
LH: loop header
LB: loop body
LE: loop exit
PB: predicated region body
PF: predicated region fallthrough
CT: control target
= control target key end

     0   :  { %12 = vsyncpa [#allocation4], 0  ;;  %s2602_s0 = inlined_call_operand.hbm [shape: bf16[8,16,128], index: 0, kind: input, shape index: {}]   ;;  %s2603_s1 = inlined_call_operand.hbm [shape: bf16[384,128], index: 1, kind: input, shape index: {}]   ;;  %s2604_s2 = inlined_call_operand.hbm [shape: bf16[384,128], index: 2, kind: input, shape index: {}]   ;;  %s2605_s3 = inlined_call_operand.vmem [shape: f32[1,128], index: 3, kind: input, shape index: {}]   ;;  %s2606_s4 = inlined_call_operand.vmem [shape: f32[1,128], index: 4, kind: input, shape index: {}]   ;;  %s2607_s5 = inlined_call_operand.vmem [shape: f32[1,128], index: 5, kind: input, shape index: {}]   ;;  %s2608_s6 = inlined_call_operand.vmem [shape: f32[1,128], index: 6, kind: input, shape index: {}]   ;;  %s2609_s7 = inlined_call_operand.hbm [shape: bf16[8,16,128], index: 7, kind: output, shape index: {}]  }
   0x1   :  { %13 = vsyncpa [#allocation7], 0 }
   0x2   :  { %14 = vsyncpa [#allocation5], 0  ;;  %s2136_s24 = smov [#allocation6]   ;;  %s2137_s26 = smov [#allocation3]  }
   0x3   :  { %s32_s25 = sshll.u32 %s2136_s24, 4  ;;  %s20_s27 = sshll.u32 %s2137_s26, 4  ;;  %s33_s25 = int_to_ptr.vmem [resolvable:$true] %s32_s25  ;;  %s2182_s27 = int_to_ptr.vmem [resolvable:$true] %s20_s27 }
   0x4   :  { %s2042_s30 = scalar_lea.hbm %s2603_s1, 3072 }
   0x5   :  { %p2043_p0 = scmp.ne.s32.totalorder %s2603_s1, %s2042_s30  ;;  %p2046_p1 = scmp.lt.u32.totalorder %s2042_s30, %s2603_s1 }
   0x7   :  { %p2048_p2 = pnand %p2046_p1, %p2043_p0 }
   0x9   :  { %2051 = shalt.err (!%p2048_p2)
}
   0xa   :  { %s2052_s12 = scalar_lea.vmem %s33_s25, 3072  ;;  %p2057_p4 = scmp.lt.s32.totalorder %s33_s25, %s33_s25 }
   0xb   :  { %p2053_p3 = scmp.ne.s32.totalorder %s33_s25, %s2052_s12  ;;  %p2058_p5 = scmp.lt.s32.totalorder %s2052_s12, %s2052_s12 }
   0xd   :  { %p2059_p6 = por %p2058_p5, %p2057_p4 }
   0xf   :  { %p2060_p7 = pnand %p2059_p6, %p2053_p3 }
  0x11   :  { %2063 = shalt.err (!%p2060_p7)
}
  0x12   :  { %s2138_s13 = smov 64   ;;  %s2139_s14 = smov 4  }
  0x13   :  { %38 = dma.hbm_to_vmem [thread:$0]  %s2603_s1, 3072, %s33_s25, [#allocation7], %s2138_s13, %s2138_s13, %s2139_s14  }
  0x14   :  { %s2064_s19 = scalar_lea.hbm %s2602_s0, 1024 }
  0x15   :  { %p2065_p8 = scmp.ne.s32.totalorder %s2602_s0, %s2064_s19  ;;  %p2068_p9 = scmp.lt.u32.totalorder %s2064_s19, %s2602_s0 }
  0x17   :  { %p2070_p10 = pnand %p2068_p9, %p2065_p8 }
  0x19   :  { %2073 = shalt.err (!%p2070_p10)
}
  0x1a   :  { %s2074_s24 = scalar_lea.vmem %s2182_s27, 1024  ;;  %p2079_p12 = scmp.lt.s32.totalorder %s2182_s27, %s2182_s27 }
  0x1b   :  { %p2075_p11 = scmp.ne.s32.totalorder %s2182_s27, %s2074_s24  ;;  %p2080_p13 = scmp.lt.s32.totalorder %s2074_s24, %s2074_s24 }
  0x1d   :  { %p2081_p0 = por %p2080_p13, %p2079_p12 }
  0x1f   :  { %p2082_p1 = pnand %p2081_p0, %p2075_p11 }
  0x21   :  { %2085 = shalt.err (!%p2082_p1)
}
  0x22   :  { %26 = dma.hbm_to_vmem [thread:$0]  %s2602_s0, 1024, %s2182_s27, [#allocation4], %s2138_s13, %s2138_s13, %s2139_s14  }
  0x23   :  { %s2140_s26 = smov [#allocation8]   ;;  %s2086_s8 = scalar_lea.hbm %s2604_s2, 3072 }
  0x24   :  { %s44_s28 = sshll.u32 %s2140_s26, 4  ;;  %p2087_p2 = scmp.ne.s32.totalorder %s2604_s2, %s2086_s8  ;;  %s45_s28 = int_to_ptr.vmem [resolvable:$true] %s44_s28 }
  0x25   :  { %p2090_p3 = scmp.lt.u32.totalorder %s2086_s8, %s2604_s2 }
  0x27   :  { %p2092_p4 = pnand %p2090_p3, %p2087_p2 }
  0x29   :  { %2095 = shalt.err (!%p2092_p4)
}
  0x2a   :  { %s2096_s15 = scalar_lea.vmem %s45_s28, 3072  ;;  %p2101_p6 = scmp.lt.s32.totalorder %s45_s28, %s45_s28 }
  0x2b   :  { %p2097_p5 = scmp.ne.s32.totalorder %s45_s28, %s2096_s15  ;;  %p2102_p7 = scmp.lt.s32.totalorder %s2096_s15, %s2096_s15 }
  0x2d   :  { %p2103_p8 = por %p2102_p7, %p2101_p6 }
  0x2f   :  { %p2104_p9 = pnand %p2103_p8, %p2097_p5 }
  0x31   :  { %2107 = shalt.err (!%p2104_p9)
}
  0x32   :  { %50 = dma.hbm_to_vmem [thread:$0]  %s2604_s2, 3072, %s45_s28, [#allocation7], %s2138_s13, %s2138_s13, %s2139_s14  }
  0x33   :  { %2130 = dma.done.wait [#allocation4], 1024  }
  0x34   :  { %2131 = vsyncadd [#allocation4], 4294966272 }
  0x35   :  { %2132 = dma.done.wait [#allocation7], 6144  }
  0x36   :  { %2133 = vsyncadd [#allocation7], 4294961152  ;;  %v1986_v0 = vld [vmem:[#allocation6 + $0x40] sm:$0xff]   ;;  %v1989_v3 = vld [vmem:[#allocation6 + $0x48] sm:$0xff]   ;;  %vm97_vm0 = vsmask.f32 7966 }
  0x37   :  { %v1987_v1 = vld [vmem:[#allocation6 + $0x80] sm:$0xff]   ;;  %1756 = vmatprep.subr.bf16.mxu0 %v1986_v0  ;;  %v1990_v4 = vld [vmem:[#allocation6 + $0x88] sm:$0xff]   ;;  %v1992_v6 = vld [vmem:[#allocation6 + $0x50] sm:$0xff]   ;;  %vm96_vm1 = vcmask 1047559   ;;  %vm70_vm2 = vsmask.f32 256 }
  0x38   :  { %v1988_v2 = vld [vmem:[#allocation6] sm:$0xff]   ;;  %1916 = vmatprep.subr.bf16.mxu1 %v1987_v1  ;;  %v1991_v5 = vld [vmem:[#allocation6 + $0x8] sm:$0xff]   ;;  %v1993_v7 = vld [vmem:[#allocation6 + $0x90] sm:$0xff]   ;;  %vm69_vm4 = vcmask 1040384   ;;  %vm310_vm6 = vsmask.f32 7424 }
  0x39   :  { %1757 = vmatpush3.bf16.msra.mxu0 %v1988_v2  ;;  %1917 = vmatpush3.bf16.msra.mxu1 %v1987_v1  ;;  %v1994_v8 = vld [vmem:[#allocation6 + $0x10] sm:$0xff]   ;;  %v1995_v9 = vld [vmem:[#allocation6 + $0x58] sm:$0xff]   ;;  %v1998_v12 = vld [vmem:[#allocation6 + $0x60] sm:$0xff]   ;;  %vm244_vm7 = vsmask.f32 7938  ;;  %vm243_vm8 = vcmask 1047552  }
  0x3a   :  { %1758 = vmatprep.subr.bf16.mxu0 %v1989_v3  ;;  %1918 = vmatprep.subr.bf16.mxu1 %v1990_v4  ;;  %v1996_v10 = vld [vmem:[#allocation6 + $0x98] sm:$0xff]   ;;  %v1999_v13 = vld [vmem:[#allocation6 + $0xa0] sm:$0xff]   ;;  %vm2235_vm3 = vmand %vm96_vm1, %vm97_vm0 }
  0x3b   :  { %v1997_v11 = vld [vmem:[#allocation6 + $0x18] sm:$0xff]   ;;  %v2000_v14 = vld [vmem:[#allocation6 + $0x20] sm:$0xff]   ;;  %v2001_v16 = vld [vmem:[#allocation6 + $0x68] sm:$0xff]  }
  0x3c   :  { %v2002_v17 = vld [vmem:[#allocation6 + $0xa8] sm:$0xff]   ;;  %vm2239_vm5 = vmand %vm69_vm4, %vm70_vm2  ;;  %v2004_v20 = vld [vmem:[#allocation6 + $0x70] sm:$0xff]  }
  0x3d   :  { %1759 = vmatpush3.bf16.msra.mxu0 %v1991_v5  ;;  %1919 = vmatpush3.bf16.msra.mxu1 %v1990_v4  ;;  %v2003_v19 = vld [vmem:[#allocation6 + $0x28] sm:$0xff]   ;;  %v2005_v21 = vld [vmem:[#allocation6 + $0xb0] sm:$0xff]   ;;  %v2007_v23 = vld [vmem:[#allocation6 + $0x78] sm:$0xff]  }
  0x3e   :  { %1760 = vmatprep.subr.bf16.mxu0 %v1992_v6  ;;  %1920 = vmatprep.subr.bf16.mxu1 %v1993_v7  ;;  %v2006_v22 = vld [vmem:[#allocation6 + $0x30] sm:$0xff]   ;;  %v2008_v24 = vld [vmem:[#allocation6 + $0xb8] sm:$0xff]   ;;  %v2010_v25 = vld [vmem:[#allocation3] sm:$0xff]  }
  0x3f   :  { %v99_v26 = vld [vmem:[#allocation2 + $0x10] sm:$0x80]  ;;  %v72_v27 = vld [vmem:[#allocation2] sm:$0x1]  ;;  %v102_v28 = vld [vmem:[#allocation2 + $0x28] sm:$0x80]  ;;  %584 = vmatprep.mubr.bf16.mxu0 %v2010_v25 }
  0x40   :  { %v2009_v29 = vld [vmem:[#allocation6 + $0x38] sm:$0xff]   ;;  %v180_v30 = vshrl.u32 %v2010_v25, 16  ;;  %v183_v31 = vshll.u32 %v2010_v25, 16  ;;  %v100_v32 = vsel %vm2235_vm3, 0, %v99_v26  ;;  %v73_v33 = vsel %vm2239_vm5, 0, %v72_v27  ;;  %v2011_v35 = vld [vmem:[#allocation3 + $0x8] sm:$0xff]   ;;  %vm2261_vm9 = vmand %vm243_vm8, %vm310_vm6 }
  0x41   :  { %1761 = vmatpush3.bf16.msra.mxu0 %v1994_v8  ;;  %1921 = vmatpush3.bf16.msra.mxu1 %v1993_v7  ;;  %101 = vst [vmem:[#allocation2 + $0x10] sm:$0x80] %v100_v32  ;;  %74 = vst [vmem:[#allocation2] sm:$0x1] %v73_v33  ;;  %v103_v34 = vsel %vm2235_vm3, 0, %v102_v28  ;;  %v2251_v41 = vld [vmem:[#allocation3 + $0x10] sm:$0xff]  }
  0x42   :  { %1762 = vmatprep.subr.bf16.mxu0 %v1995_v9  ;;  %1922 = vmatprep.subr.bf16.mxu1 %v1996_v10  ;;  %v75_v36 = vld [vmem:[#allocation2 + $0x18] sm:$0x1]  ;;  %v182_v37 = vrot.slane %v180_v30, 7  ;;  %v286_v38 = vrot.slane %v183_v31, 1  ;;  %104 = vst [vmem:[#allocation2 + $0x28] sm:$0x80] %v103_v34  ;;  %vm2269_vm10 = vmand %vm243_vm8, %vm244_vm7 }
  0x43   :  { %v76_v39 = vsel %vm2239_vm5, 0, %v75_v36  ;;  %v105_v40 = vld [vmem:[#allocation2 + $0x40] sm:$0x80]  ;;  %v187_v42 = vshrl.u32 %v2011_v35, 16  ;;  %v190_v43 = vshll.u32 %v2011_v35, 16  ;;  %v2255_v45 = vld [vmem:[#allocation3 + $0x18] sm:$0xff]  }
  0x44   :  { %77 = vst [vmem:[#allocation2 + $0x18] sm:$0x1] %v76_v39  ;;  %v106_v44 = vsel %vm2235_vm3, 0, %v105_v40  ;;  %v185_v46 = vor.u32 %v183_v31, %v182_v37  ;;  %v194_v47 = vshrl.u32 %v2251_v41, 16  ;;  %v197_v48 = vshll.u32 %v2251_v41, 16  ;;  %v2283_v5 = vld [vmem:[#allocation3 + $0x20] sm:$0xff]  }
  0x45   :  { %1763 = vmatpush3.bf16.msra.mxu0 %v1997_v11  ;;  %1923 = vmatpush3.bf16.msra.mxu1 %v1996_v10  ;;  %107 = vst [vmem:[#allocation2 + $0x40] sm:$0x80] %v106_v44  ;;  %v108_v49 = vld [vmem:[#allocation2 + $0x58] sm:$0x80]  ;;  %v287_v50 = vor.u32 %v286_v38, %v180_v30  ;;  %v288_v52 = vrot.slane %v190_v43, 1  ;;  %v189_v53 = vrot.slane %v187_v42, 7 }
  0x46   :  { %1764 = vmatprep.subr.bf16.mxu0 %v1998_v12  ;;  %1924 = vmatprep.subr.bf16.mxu1 %v1999_v13  ;;  %v109_v54 = vsel %vm2235_vm3, 0, %v108_v49  ;;  %v290_v56 = vrot.slane %v197_v48, 1  ;;  %v204_v57 = vshll.u32 %v2255_v45, 16  ;;  %v78_v58 = vld [vmem:[#allocation2 + $0x30] sm:$0x1]  ;;  %v201_v2 = vshrl.u32 %v2255_v45, 16 }
  0x47   :  { %110 = vst [vmem:[#allocation2 + $0x58] sm:$0x80] %v109_v54  ;;  %v289_v59 = vor.u32 %v288_v52, %v187_v42  ;;  %v79_v60 = vsel %vm2239_vm5, 0, %v78_v58  ;;  %v81_v61 = vld [vmem:[#allocation2 + $0x48] sm:$0x1]  ;;  %v192_v11 = vor.u32 %v190_v43, %v189_v53  ;;  %v2314_v25 = vld [vmem:[#allocation3 + $0x30] sm:$0xff]  }
  0x48   :  { %v111_v62 = vld [vmem:[#allocation2 + $0x70] sm:$0x80]  ;;  %v246_v0 = vld [vmem:[#allocation2] sm:$0xff]  ;;  %v291_v1 = vor.u32 %v290_v56, %v194_v47  ;;  %v292_v3 = vrot.slane %v204_v57, 1  ;;  %80 = vst [vmem:[#allocation2 + $0x30] sm:$0x1] %v79_v60 }
  0x49   :  { %1765 = vmatpush3.bf16.msra.mxu0 %v2000_v14  ;;  %1925 = vmatpush3.bf16.msra.mxu1 %v1999_v13  ;;  %v312_v63 = vld [vmem:[#allocation2 + $0x10] sm:$0xff]  ;;  %v82_v4 = vsel %vm2239_vm5, 0, %v81_v61  ;;  %v2291_v7 = vsel %vm2269_vm10, %v185_v46, %v246_v0  ;;  %v315_v8 = vld [vmem:[#allocation2 + $0x28] sm:$0xff]  ;;  %v112_v9 = vsel %vm2235_vm3, 0, %v111_v62  ;;  %v208_v13 = vshrl.u32 %v2283_v5, 16  ;;  %v2334_v38 = vld [vmem:[#allocation3 + $0x38] sm:$0xff]  }
  0x4a   :  { %1766 = vmatprep.subr.bf16.mxu0 %v2001_v16  ;;  %1926 = vmatprep.subr.bf16.mxu1 %v2002_v17  ;;  %v2287_v6 = vsel %vm2261_vm9, %v287_v50, %v312_v63  ;;  %83 = vst [vmem:[#allocation2 + $0x48] sm:$0x1] %v82_v4  ;;  %v2299_v10 = vsel %vm2261_vm9, %v289_v59, %v315_v8  ;;  %113 = vst [vmem:[#allocation2 + $0x70] sm:$0x80] %v112_v9  ;;  %v114_v14 = vld [vmem:[#allocation2 + $0x88] sm:$0x80] }
  0x4b   :  { %1932 = vmatprep.mubr.bf16.mxu1 %v2287_v6  ;;  %v249_v12 = vld [vmem:[#allocation2 + $0x18] sm:$0xff]  ;;  %v196_v31 = vrot.slane %v194_v47, 7  ;;  %v117_v33 = vld [vmem:[#allocation2 + $0xa0] sm:$0x80]  ;;  %v222_v37 = vshrl.u32 %v2314_v25, 16  ;;  %v225_v42 = vshll.u32 %v2314_v25, 16 }
  0x4c   :  { %v318_v16 = vld [vmem:[#allocation2 + $0x40] sm:$0xff]  ;;  %v2324_v30 = vsel %vm2269_vm10, %v192_v11, %v249_v12  ;;  %v118_v36 = vsel %vm2235_vm3, 0, %v117_v33  ;;  %v120_v43 = vld [vmem:[#allocation2 + $0xb8] sm:$0x80]  ;;  %v90_v47 = vld [vmem:[#allocation2 + $0x90] sm:$0x1] }
  0x4d   :  { %1767 = vmatpush3.bf16.msra.mxu0 %v2003_v19  ;;  %1927 = vmatpush3.bf16.msra.mxu1 %v2002_v17  ;;  %v211_v17 = vshll.u32 %v2283_v5, 16  ;;  %v115_v19 = vsel %vm2235_vm3, 0, %v114_v14  ;;  %119 = vst [vmem:[#allocation2 + $0xa0] sm:$0x80] %v118_v36  ;;  %v121_v46 = vsel %vm2235_vm3, 0, %v120_v43  ;;  %v298_v50 = vrot.slane %v225_v42, 1 }
  0x4e   :  { %1768 = vmatprep.subr.bf16.mxu0 %v2004_v20  ;;  %1928 = vmatprep.subr.bf16.mxu1 %v2005_v21  ;;  %v2306_v20 = vld [vmem:[#allocation3 + $0x28] sm:$0xff]   ;;  %116 = vst [vmem:[#allocation2 + $0x88] sm:$0x80] %v115_v19  ;;  %v321_v26 = vld [vmem:[#allocation2 + $0x58] sm:$0xff]  ;;  %122 = vst [vmem:[#allocation2 + $0xb8] sm:$0x80] %v121_v46  ;;  %v199_v54 = vor.u32 %v197_v48, %v196_v31 }
  0x4f   :  { %v294_v27 = vrot.slane %v211_v17, 1  ;;  %v218_v28 = vshll.u32 %v2306_v20, 16  ;;  %v93_v52 = vld [vmem:[#allocation2 + $0xa8] sm:$0x1]  ;;  %v2018_v53 = vld [vmem:[#allocation8 + $0x40] sm:$0xff]   ;;  %v232_v15 = vshll.u32 %v2334_v38, 16 }
  0x50   :  { %v91_v56 = vsel %vm2239_vm5, 0, %v90_v47  ;;  %v94_v58 = vsel %vm2239_vm5, 0, %v93_v52  ;;  %v252_v59 = vld [vmem:[#allocation2 + $0x30] sm:$0xff]  ;;  %v2019_v48 = vld [vmem:[#allocation8] sm:$0xff]   ;;  %v203_v62 = vrot.slane %v201_v2, 7  ;;  %v229_v63 = vshrl.u32 %v2334_v38, 16 }
  0x51   :  { %1769 = vmatpush3.bf16.msra.mxu0 %v2006_v22  ;;  %1929 = vmatpush3.bf16.msra.mxu1 %v2005_v21  ;;  %v2310_v21 = vsel %vm2261_vm9, %v291_v1, %v318_v16  ;;  %v293_v22 = vor.u32 %v292_v3, %v201_v2  ;;  %v295_v34 = vor.u32 %v294_v27, %v208_v13  ;;  %v296_v40 = vrot.slane %v218_v28, 1  ;;  %v324_v44 = vld [vmem:[#allocation2 + $0x70] sm:$0xff]  ;;  %v255_v8 = vld [vmem:[#allocation2 + $0x48] sm:$0xff]  ;;  %v2020_v33 = vld [vmem:[#allocation8 + $0x80] sm:$0xff]  }
  0x52   :  { %1770 = vmatprep.subr.bf16.mxu0 %v2007_v23  ;;  %1930 = vmatprep.subr.bf16.mxu1 %v2008_v24  ;;  %v84_v23 = vld [vmem:[#allocation2 + $0x60] sm:$0x1]  ;;  %92 = vst [vmem:[#allocation2 + $0x90] sm:$0x1] %v91_v56  ;;  %95 = vst [vmem:[#allocation2 + $0xa8] sm:$0x1] %v94_v58  ;;  %v2367_v18 = vsel %vm2269_vm10, %v199_v54, %v252_v59  ;;  %v206_v2 = vor.u32 %v204_v57, %v203_v62 }
  0x53   :  { %v2338_v39 = vsel %vm2261_vm9, %v293_v22, %v321_v26  ;;  %v2348_v49 = vsel %vm2261_vm9, %v295_v34, %v324_v44  ;;  %v300_v1 = vrot.slane %v232_v15, 1  ;;  %v210_v9 = vrot.slane %v208_v13, 7  ;;  %v2023_v34 = vld [vmem:[#allocation8 + $0x50] sm:$0xff]   ;;  %v2025_v36 = vld [vmem:[#allocation8 + $0x88] sm:$0xff]   ;;  %v2029_v43 = vld [vmem:[#allocation8 + $0x20] sm:$0xff]  }
  0x54   :  { %v330_v0 = vld [vmem:[#allocation2 + $0xa0] sm:$0xff]  ;;  %v2387_v14 = vsel %vm2269_vm10, %v206_v2, %v255_v8  ;;  %v2031_v44 = vld [vmem:[#allocation8 + $0x68] sm:$0xff]   ;;  %v2033_v46 = vld [vmem:[#allocation8 + $0x98] sm:$0xff]  }
  0x55   :  { %1771 = vmatpush3.bf16.msra.mxu0 %v2009_v29  ;;  %1931 = vmatpush3.bf16.msra.mxu1 %v2008_v24  ;;  %v87_v24 = vld [vmem:[#allocation2 + $0x78] sm:$0x1]  ;;  %v85_v29 = vsel %vm2239_vm5, 0, %v84_v23  ;;  %v327_v61 = vld [vmem:[#allocation2 + $0x88] sm:$0xff]  ;;  %v301_v12 = vor.u32 %v300_v1, %v229_v63  ;;  %v213_v57 = vor.u32 %v211_v17, %v210_v9  ;;  %v2036_v52 = vld [vmem:[#allocation8 + $0xa0] sm:$0xff]  }
  0x56   :  { %86 = vst [vmem:[#allocation2 + $0x60] sm:$0x1] %v85_v29  ;;  %v88_v32 = vsel %vm2239_vm5, 0, %v87_v24  ;;  %1836 = vmatprep.subr.bf16.mxu1 %v2018_v53  ;;  %v333_v11 = vld [vmem:[#allocation2 + $0xb8] sm:$0xff]  ;;  %1948 = vmatprep.subr.bf16.mxu0 %v2020_v33  ;;  %v2032_v47 = vld [vmem:[#allocation8 + $0x28] sm:$0xff]   ;;  %v2035_v53 = vld [vmem:[#allocation8 + $0x30] sm:$0xff]  }
  0x57   :  { %89 = vst [vmem:[#allocation2 + $0x78] sm:$0x1] %v88_v32  ;;  %v2391_v16 = vsel %vm2261_vm9, %v301_v12, %v333_v11  ;;  %v2022_v32 = vld [vmem:[#allocation8 + $0x8] sm:$0xff]   ;;  %v2037_v54 = vld [vmem:[#allocation8 + $0x78] sm:$0xff]   ;;  %v2040_v58 = vld [vmem:[#allocation8 + $0xb0] sm:$0xff]  }
  0x58   :  { %585 = vmatmul.mubr.bf16.vlgmr.msra.gmra.mrb[0].mxu0 %v2291_v7  ;;  %1933 = vmatmul.mubr.bf16.vlgmr.msra.gmra.mrb[0].mxu1 %v2299_v10  ;;  %v2038_v56 = vld [vmem:[#allocation8 + $0x38] sm:$0xff]   ;;  %v2433_v12 = vld [vmem:[%s2606_s4] ss:$0 sm:$0xff] }
  0x59   :  { %592 = vmatprep.mubr.bf16.mxu0 %v2011_v35  ;;  %1936 = vmatprep.mubr.bf16.mxu1 %v2310_v21  ;;  %v215_v35 = vshrl.u32 %v2306_v20, 16  ;;  %v264_v26 = vld [vmem:[#allocation2 + $0x90] sm:$0xff]  ;;  %v267_v29 = vld [vmem:[#allocation2 + $0xa8] sm:$0xff]  ;;  %v2041_v59 = vld [vmem:[#allocation8 + $0xb8] sm:$0xff]  }
  0x5a   :  { %1837 = vmatpush3.bf16.msra.mxu1 %v2019_v48  ;;  %1949 = vmatpush3.bf16.msra.mxu0 %v2020_v33  ;;  %v2548_v55 = vld [vmem:[%s2607_s5] ss:$0 sm:$0xff]  ;;  %s2141_s5 = smov [#allocation9]  }
  0x5b   :  { %v297_v60 = vor.u32 %v296_v40, %v215_v35  ;;  %v217_v19 = vrot.slane %v215_v35, 7  ;;  %v2024_v35 = vld [vmem:[#allocation8 + $0x10] sm:$0xff]   ;;  %1950 = vmatprep.subr.bf16.mxu0 %v2025_v36  ;;  %v2028_v40 = vld [vmem:[#allocation8 + $0x60] sm:$0xff]  }
  0x5d   :  { %v2371_v3 = vsel %vm2261_vm9, %v297_v60, %v327_v61  ;;  %v220_v22 = vor.u32 %v218_v28, %v217_v19 }
  0x5e   :  { %v261_v23 = vld [vmem:[#allocation2 + $0x78] sm:$0xff]  ;;  %1951 = vmatpush3.bf16.msra.mxu0 %v2025_v36 }
  0x5f   :  { %v2408_v24 = vsel %vm2269_vm10, %v220_v22, %v261_v23 }
  0x60   :  { %593 = vmatmul.mubr.bf16.gmra.mrb[4].mxu0 %v2324_v30  ;;  %1937 = vmatmul.mubr.bf16.gmra.mrb[4].mxu1 %v2338_v39 }
  0x61   :  { %600 = vmatprep.mubr.bf16.mxu0 %v2251_v41  ;;  %1940 = vmatprep.mubr.bf16.mxu1 %v2348_v49  ;;  %v299_v41 = vor.u32 %v298_v50, %v222_v37  ;;  %v2034_v50 = vld [vmem:[#allocation8 + $0x70] sm:$0xff]  }
  0x63   :  { %v2375_v4 = vsel %vm2261_vm9, %v299_v41, %v330_v0  ;;  %v2428_v0 = vld [vmem:[%s2605_s3] ss:$0 sm:$0xff] }
  0x68   :  { %601 = vmatmul.mubr.bf16.gmra.mrb[8].mxu0 %v2367_v18  ;;  %1941 = vmatmul.mubr.bf16.gmra.mrb[8].mxu1 %v2371_v3 }
  0x69   :  { %608 = vmatprep.mubr.bf16.mxu0 %v2255_v45  ;;  %1944 = vmatprep.mubr.bf16.mxu1 %v2375_v4  ;;  %v258_v45 = vld [vmem:[#allocation2 + $0x60] sm:$0xff] }
  0x6a   :  { %v2400_v13 = vsel %vm2269_vm10, %v213_v57, %v258_v45 }
  0x70   :  { %609 = vmatmul.mubr.bf16.gmra.mrb[12].mxu0 %v2387_v14  ;;  %1945 = vmatmul.mubr.bf16.gmra.mrb[12].mxu1 %v2391_v16 }
  0x71   :  { %616 = vmatprep.mubr.bf16.mxu0 %v2283_v5  ;;  %v224_v5 = vrot.slane %v222_v37, 7  ;;  %v2026_v37 = vld [vmem:[#allocation8 + $0x58] sm:$0xff]  }
  0x73   :  { %v227_v17 = vor.u32 %v225_v42, %v224_v5  ;;  %v2030_v42 = vld [vmem:[#allocation8 + $0x90] sm:$0xff]  }
  0x74   :  { %1952 = vmatprep.subr.bf16.mxu0 %v2030_v42 }
  0x75   :  { %v2416_v27 = vsel %vm2269_vm10, %v227_v17, %v264_v26  ;;  %1953 = vmatpush3.bf16.msra.mxu0 %v2030_v42 }
  0x76   :  { %1954 = vmatprep.subr.bf16.mxu0 %v2033_v46 }
  0x78   :  { %617 = vmatmul.mubr.bf16.gmra.mrb[16].mxu0 %v2400_v13 }
  0x79   :  { %624 = vmatprep.mubr.bf16.mxu0 %v2306_v20  ;;  %v231_v20 = vrot.slane %v229_v63, 7  ;;  %1955 = vmatpush3.bf16.msra.mxu0 %v2033_v46 }
  0x7a   :  { %1956 = vmatprep.subr.bf16.mxu0 %v2036_v52 }
  0x7b   :  { %v234_v28 = vor.u32 %v232_v15, %v231_v20  ;;  %v2039_v15 = vld [vmem:[#allocation8 + $0xa8] sm:$0xff]  }
  0x7d   :  { %v2422_v31 = vsel %vm2269_vm10, %v234_v28, %v267_v29  ;;  %1957 = vmatpush3.bf16.msra.mxu0 %v2036_v52 }
  0x7e   :  { %1958 = vmatprep.subr.bf16.mxu0 %v2039_v15 }
  0x80   :  { %625 = vmatmul.mubr.bf16.gmra.mrb[20].mxu0 %v2408_v24 }
  0x81   :  { %632 = vmatprep.mubr.bf16.mxu0 %v2314_v25  ;;  %v2021_v25 = vld [vmem:[#allocation8 + $0x48] sm:$0xff]   ;;  %1959 = vmatpush3.bf16.msra.mxu0 %v2039_v15 }
  0x82   :  { %1838 = vmatprep.subr.bf16.mxu1 %v2021_v25  ;;  %1960 = vmatprep.subr.bf16.mxu0 %v2040_v58 }
  0x83   :  { %1839 = vmatpush3.bf16.msra.mxu1 %v2022_v32 }
  0x84   :  { %1840 = vmatprep.subr.bf16.mxu1 %v2023_v34 }
  0x85   :  { %1961 = vmatpush3.bf16.msra.mxu0 %v2040_v58 }
  0x86   :  { %1962 = vmatprep.subr.bf16.mxu0 %v2041_v59 }
  0x87   :  { %1841 = vmatpush3.bf16.msra.mxu1 %v2024_v35 }
  0x88   :  { %633 = vmatmul.mubr.bf16.gmra.mrb[24].mxu0 %v2416_v27  ;;  %1842 = vmatprep.subr.bf16.mxu1 %v2026_v37 }
  0x89   :  { %640 = vmatprep.mubr.bf16.mxu0 %v2334_v38  ;;  %v2027_v38 = vld [vmem:[#allocation8 + $0x18] sm:$0xff]   ;;  %1963 = vmatpush3.bf16.msra.mxu0 %v2041_v59 }
  0x8b   :  { %1843 = vmatpush3.bf16.msra.mxu1 %v2027_v38 }
  0x8c   :  { %1844 = vmatprep.subr.bf16.mxu1 %v2028_v40 }
  0x8f   :  { %1845 = vmatpush3.bf16.msra.mxu1 %v2029_v43 }
  0x90   :  { %641 = vmatmul.mubr.bf16.gmra.mrb[28].mxu0 %v2422_v31  ;;  %1846 = vmatprep.subr.bf16.mxu1 %v2031_v44 }
  0x93   :  { %1847 = vmatpush3.bf16.msra.mxu1 %v2032_v47 }
  0x94   :  { %1848 = vmatprep.subr.bf16.mxu1 %v2034_v50 }
  0x97   :  { %1849 = vmatpush3.bf16.msra.mxu1 %v2035_v53 }
  0x98   :  { %1850 = vmatprep.subr.bf16.mxu1 %v2037_v54 }
  0x9b   :  { %1851 = vmatpush3.bf16.msra.mxu1 %v2038_v56 }
 0x12b   :  { %v1772_v60 = vpop.f32.mrb[0].mxu0  ;;  %v1934_v61 = vpop.f32.mrb[0].mxu1 }
 0x12c   :  { %v1773_v41 = vpop.f32.mrb[1].mxu0  ;;  %v683_v62 = vpop.f32.mrb[1].mxu1 }
 0x12d   :  { %v1774_v48 = vadd.f32 %v1773_v41, %v1772_v60  ;;  %v1775_v63 = vpop.f32.mrb[2].mxu0  ;;  %v1935_v1 = vpop.f32.mrb[2].mxu1 }
 0x12e   :  { %v1776_v2 = vpop.f32.mrb[3].mxu0  ;;  %v686_v11 = vpop.f32.mrb[3].mxu1 }
 0x12f   :  { %v684_v8 = vadd.f32 %v1774_v48, %v683_v62  ;;  %v1777_v9 = vadd.f32 %v1776_v2, %v1775_v63 }
 0x131   :  { %v753_v45 = vmul.f32 %v2428_v0, %v684_v8  ;;  %v687_v57 = vadd.f32 %v1777_v9, %v686_v11 }
 0x133   :  { %v776_v19 = vadd.f32 %v2433_v12, %v753_v45  ;;  %v754_v22 = vmul.f32 %v2428_v0, %v687_v57  ;;  %v1778_v23 = vpop.f32.mrb[4].mxu0  ;;  %v2438_v17 = vpop.f32.mrb[4].mxu1 }
 0x134   :  { %v1779_v5 = vpop.f32.mrb[5].mxu0  ;;  %v699_v29 = vpop.f32.mrb[5].mxu1 }
 0x135   :  { %v777_v26 = vadd.f32 %v2433_v12, %v754_v22  ;;  %v1780_v20 = vadd.f32 %v1779_v5, %v1778_v23  ;;  %v1781_v28 = vpop.f32.mrb[6].mxu0  ;;  %v2441_v32 = vpop.f32.mrb[6].mxu1  ;;  %v792_v33 = vmax.f32 %v776_v19, 0.0 }
 0x136   :  { %v1782_v25 = vpop.f32.mrb[7].mxu0  ;;  %v702_v37 = vpop.f32.mrb[7].mxu1 }
 0x137   :  { %v793_v34 = vmax.f32 %v777_v26, 0.0  ;;  %v692_v35 = vadd.f32 %v1934_v61, %v1780_v20  ;;  %v1783_v36 = vadd.f32 %v1782_v25, %v1781_v28 }
 0x139   :  { %v808_v38 = vpack.c.bf16 %v793_v34, %v792_v33  ;;  %v755_v40 = vmul.f32 %v2428_v0, %v692_v35  ;;  %v695_v42 = vadd.f32 %v1935_v1, %v1783_v36 }
 0x13b   :  { %v817_v43 = vshrl.u32 %v808_v38, 16  ;;  %v820_v44 = vshll.u32 %v808_v38, 16  ;;  %v778_v46 = vadd.f32 %v2433_v12, %v755_v40  ;;  %v756_v47 = vmul.f32 %v2428_v0, %v695_v42  ;;  %v1784_v50 = vpop.f32.mrb[8].mxu0  ;;  %1208 = vmatprep.mubr.bf16.mxu1 %v808_v38  ;;  %v2446_v53 = vpop.f32.mrb[8].mxu1 }
 0x13c   :  { %v1785_v52 = vpop.f32.mrb[9].mxu0  ;;  %v2449_v59 = vpop.f32.mrb[9].mxu1 }
 0x13d   :  { %v819_v54 = vrot.slane %v817_v43, 7  ;;  %v912_v15 = vrot.slane %v820_v44, 1  ;;  %v779_v56 = vadd.f32 %v2433_v12, %v756_v47  ;;  %v1787_v58 = vpop.f32.mrb[10].mxu0  ;;  %v794_v60 = vmax.f32 %v778_v46, 0.0  ;;  %v2451_v48 = vpop.f32.mrb[10].mxu1 }
 0x13e   :  { %v1786_v61 = vadd.f32 %v1785_v52, %v1784_v50  ;;  %v1788_v41 = vpop.f32.mrb[11].mxu0  ;;  %v2453_v8 = vpop.f32.mrb[11].mxu1 }
 0x13f   :  { %v822_v62 = vor.u32 %v820_v44, %v819_v54  ;;  %v913_v63 = vor.u32 %v912_v15, %v817_v43  ;;  %v795_v1 = vmax.f32 %v779_v56, 0.0  ;;  %v1789_v2 = vadd.f32 %v1788_v41, %v1787_v58 }
 0x140   :  { %v700_v9 = vadd.f32 %v1786_v61, %v699_v29 }
 0x141   :  { %v881_v11 = vsel %vm2269_vm10, %v822_v62, %v2291_v7  ;;  %v937_v45 = vsel %vm2261_vm9, %v913_v63, %v2287_v6  ;;  %v809_v57 = vpack.c.bf16 %v795_v1, %v794_v60  ;;  %v703_v19 = vadd.f32 %v1789_v2, %v702_v37 }
 0x142   :  { %882 = vst [vmem:[#allocation2] sm:$0xff] %v881_v11  ;;  %938 = vst [vmem:[#allocation2 + $0x10] sm:$0xff] %v937_v45  ;;  %v757_v22 = vmul.f32 %v2428_v0, %v700_v9  ;;  %1209 = vmatmul.mubr.bf16.vlgmr.msra.gmra.mrb[16].mxu1 %v881_v11  ;;  %1964 = vmatprep.mubr.bf16.mxu0 %v937_v45 }
 0x143   :  { %v824_v23 = vshrl.u32 %v809_v57, 16  ;;  %v827_v5 = vshll.u32 %v809_v57, 16  ;;  %v758_v26 = vmul.f32 %v2428_v0, %v703_v19  ;;  %v1790_v20 = vpop.f32.mrb[12].mxu0  ;;  %1216 = vmatprep.mubr.bf16.mxu1 %v809_v57  ;;  %v2464_v29 = vpop.f32.mrb[12].mxu1 }
 0x144   :  { %v780_v7 = vadd.f32 %v2433_v12, %v757_v22  ;;  %v1791_v28 = vpop.f32.mrb[13].mxu0  ;;  %v2467_v36 = vpop.f32.mrb[13].mxu1 }
 0x145   :  { %v826_v6 = vrot.slane %v824_v23, 7  ;;  %v914_v25 = vrot.slane %v827_v5, 1  ;;  %v781_v33 = vadd.f32 %v2433_v12, %v758_v26  ;;  %v1792_v34 = vadd.f32 %v1791_v28, %v1790_v20  ;;  %v1793_v35 = vpop.f32.mrb[14].mxu0  ;;  %v2469_v40 = vpop.f32.mrb[14].mxu1 }
 0x146   :  { %v796_v37 = vmax.f32 %v780_v7, 0.0  ;;  %v1794_v38 = vpop.f32.mrb[15].mxu0  ;;  %v2472_v47 = vpop.f32.mrb[15].mxu1 }
 0x147   :  { %v829_v42 = vor.u32 %v827_v5, %v826_v6  ;;  %v915_v43 = vor.u32 %v914_v25, %v824_v23  ;;  %v797_v44 = vmax.f32 %v781_v33, 0.0  ;;  %v708_v46 = vadd.f32 %v2438_v17, %v1792_v34 }
 0x148   :  { %v1795_v50 = vadd.f32 %v1794_v38, %v1793_v35 }
 0x149   :  { %v884_v52 = vsel %vm2269_vm10, %v829_v42, %v2324_v30  ;;  %v940_v54 = vsel %vm2261_vm9, %v915_v43, %v2299_v10  ;;  %v810_v15 = vpack.c.bf16 %v797_v44, %v796_v37  ;;  %v759_v56 = vmul.f32 %v2428_v0, %v708_v46 }
 0x14a   :  { %885 = vst [vmem:[#allocation2 + $0x18] sm:$0xff] %v884_v52  ;;  %941 = vst [vmem:[#allocation2 + $0x28] sm:$0xff] %v940_v54  ;;  %v711_v58 = vadd.f32 %v2441_v32, %v1795_v50  ;;  %1217 = vmatmul.mubr.bf16.gmra.mrb[20].mxu1 %v884_v52  ;;  %1965 = vmatmul.mubr.bf16.vlgmr.msra.gmra.mrb[32].mxu0 %v940_v54 }
 0x14b   :  { %v831_v17 = vshrl.u32 %v810_v15, 16  ;;  %v834_v60 = vshll.u32 %v810_v15, 16  ;;  %v1796_v61 = vpop.f32.mrb[16].mxu0  ;;  %1224 = vmatprep.mubr.bf16.mxu1 %v810_v15  ;;  %v782_v41 = vadd.f32 %v2433_v12, %v759_v56 }
 0x14c   :  { %v760_v30 = vmul.f32 %v2428_v0, %v711_v58  ;;  %v1797_v62 = vpop.f32.mrb[17].mxu0 }
 0x14d   :  { %v833_v63 = vrot.slane %v831_v17, 7  ;;  %v916_v10 = vrot.slane %v834_v60, 1  ;;  %v1798_v1 = vadd.f32 %v1797_v62, %v1796_v61  ;;  %v1799_v2 = vpop.f32.mrb[18].mxu0  ;;  %v798_v22 = vmax.f32 %v782_v41, 0.0 }
 0x14e   :  { %v783_v9 = vadd.f32 %v2433_v12, %v760_v30  ;;  %v1800_v11 = vpop.f32.mrb[19].mxu0 }
 0x14f   :  { %v836_v45 = vor.u32 %v834_v60, %v833_v63  ;;  %v917_v32 = vor.u32 %v916_v10, %v831_v17  ;;  %v716_v57 = vadd.f32 %v1798_v1, %v2449_v59  ;;  %v1801_v19 = vadd.f32 %v1800_v11, %v1799_v2 }
 0x150   :  { %v799_v23 = vmax.f32 %v783_v9, 0.0 }
 0x151   :  { %v887_v5 = vsel %vm2269_vm10, %v836_v45, %v2367_v18  ;;  %v943_v26 = vsel %vm2261_vm9, %v917_v32, %v2310_v21  ;;  %v761_v20 = vmul.f32 %v2428_v0, %v716_v57  ;;  %v719_v7 = vadd.f32 %v1801_v19, %v2453_v8 }
 0x152   :  { %888 = vst [vmem:[#allocation2 + $0x30] sm:$0xff] %v887_v5  ;;  %944 = vst [vmem:[#allocation2 + $0x40] sm:$0xff] %v943_v26  ;;  %v811_v28 = vpack.c.bf16 %v799_v23, %v798_v22  ;;  %1225 = vmatmul.mubr.bf16.gmra.mrb[24].mxu1 %v887_v5  ;;  %1968 = vmatprep.mubr.bf16.mxu0 %v943_v26 }
 0x153   :  { %v784_v59 = vadd.f32 %v2433_v12, %v761_v20  ;;  %v762_v6 = vmul.f32 %v2428_v0, %v719_v7  ;;  %v1802_v25 = vpop.f32.mrb[20].mxu0 }
 0x154   :  { %v838_v33 = vshrl.u32 %v811_v28, 16  ;;  %v841_v18 = vshll.u32 %v811_v28, 16  ;;  %v1803_v34 = vpop.f32.mrb[21].mxu0  ;;  %1232 = vmatprep.mubr.bf16.mxu1 %v811_v28 }
 0x155   :  { %v785_v21 = vadd.f32 %v2433_v12, %v762_v6  ;;  %v1804_v35 = vadd.f32 %v1803_v34, %v1802_v25  ;;  %v1805_v37 = vpop.f32.mrb[22].mxu0  ;;  %v800_v43 = vmax.f32 %v784_v59, 0.0 }
 0x156   :  { %v840_v38 = vrot.slane %v838_v33, 7  ;;  %v918_v8 = vrot.slane %v841_v18, 1  ;;  %v1806_v42 = vpop.f32.mrb[23].mxu0 }
 0x157   :  { %v801_v44 = vmax.f32 %v785_v21, 0.0  ;;  %v724_v46 = vadd.f32 %v2446_v53, %v1804_v35  ;;  %v1807_v50 = vadd.f32 %v1806_v42, %v1805_v37 }
 0x158   :  { %v843_v52 = vor.u32 %v841_v18, %v840_v38  ;;  %v919_v54 = vor.u32 %v918_v8, %v838_v33 }
 0x159   :  { %v812_v15 = vpack.c.bf16 %v801_v44, %v800_v43  ;;  %v763_v56 = vmul.f32 %v2428_v0, %v724_v46  ;;  %v727_v58 = vadd.f32 %v2451_v48, %v1807_v50 }
 0x15a   :  { %v890_v17 = vsel %vm2269_vm10, %v843_v52, %v2387_v14  ;;  %v946_v60 = vsel %vm2261_vm9, %v919_v54, %v2338_v39 }
 0x15b   :  { %891 = vst [vmem:[#allocation2 + $0x48] sm:$0xff] %v890_v17  ;;  %947 = vst [vmem:[#allocation2 + $0x58] sm:$0xff] %v946_v60  ;;  %v845_v61 = vshrl.u32 %v812_v15, 16  ;;  %v848_v53 = vshll.u32 %v812_v15, 16  ;;  %v786_v41 = vadd.f32 %v2433_v12, %v763_v56  ;;  %v764_v30 = vmul.f32 %v2428_v0, %v727_v58  ;;  %v1808_v62 = vpop.f32.mrb[24].mxu0  ;;  %1233 = vmatmul.mubr.bf16.gmra.mrb[28].mxu1 %v890_v17 }
 0x15c   :  { %1969 = vmatmul.mubr.bf16.gmra.mrb[36].mxu0 %v946_v60  ;;  %v1809_v48 = vpop.f32.mrb[25].mxu0  ;;  %1240 = vmatprep.mubr.bf16.mxu1 %v812_v15 }
 0x15d   :  { %v847_v63 = vrot.slane %v845_v61, 7  ;;  %v920_v10 = vrot.slane %v848_v53, 1  ;;  %v787_v14 = vadd.f32 %v2433_v12, %v764_v30  ;;  %v1811_v1 = vpop.f32.mrb[26].mxu0  ;;  %v802_v2 = vmax.f32 %v786_v41, 0.0 }
 0x15e   :  { %v1810_v39 = vadd.f32 %v1809_v48, %v1808_v62  ;;  %v1812_v9 = vpop.f32.mrb[27].mxu0 }
 0x15f   :  { %v850_v11 = vor.u32 %v848_v53, %v847_v63  ;;  %v921_v45 = vor.u32 %v920_v10, %v845_v61  ;;  %v803_v32 = vmax.f32 %v787_v14, 0.0  ;;  %v1813_v57 = vadd.f32 %v1812_v9, %v1811_v1 }
 0x160   :  { %v732_v19 = vadd.f32 %v1810_v39, %v2467_v36 }
 0x161   :  { %v893_v22 = vsel %vm2269_vm10, %v850_v11, %v2400_v13  ;;  %v949_v23 = vsel %vm2261_vm9, %v921_v45, %v2348_v49  ;;  %v813_v5 = vpack.c.bf16 %v803_v32, %v802_v2  ;;  %v735_v26 = vadd.f32 %v1813_v57, %v2472_v47  ;;  %v1671_v57 = vld [vmem:[#allocation3] sm:$0xff]  }
 0x162   :  { %894 = vst [vmem:[#allocation2 + $0x60] sm:$0xff] %v893_v22  ;;  %950 = vst [vmem:[#allocation2 + $0x70] sm:$0xff] %v949_v23  ;;  %v765_v20 = vmul.f32 %v2428_v0, %v732_v19  ;;  %1972 = vmatprep.mubr.bf16.mxu0 %v949_v23 }
 0x163   :  { %v852_v7 = vshrl.u32 %v813_v5, 16  ;;  %v855_v28 = vshll.u32 %v813_v5, 16  ;;  %v766_v36 = vmul.f32 %v2428_v0, %v735_v26  ;;  %v1814_v59 = vpop.f32.mrb[28].mxu0  ;;  %1241 = vmatmul.mubr.bf16.gmra.mrb[32].mxu1 %v893_v22  ;;  %v2553_v26 = vld [vmem:[%s2608_s6] ss:$0 sm:$0xff]  ;;  %s1565_s6 = sshll.u32 %s2141_s5, 4  ;;  %s1566_s6 = int_to_ptr.vmem [resolvable:$true] %s1565_s6 }
 0x164   :  { %v788_v13 = vadd.f32 %v2433_v12, %v765_v20  ;;  %v1815_v6 = vpop.f32.mrb[29].mxu0  ;;  %1248 = vmatprep.mubr.bf16.mxu1 %v813_v5  ;;  %v1672_v20 = vunpack.c.l.bf16 %v1671_v57  ;;  %s2108_s21 = scalar_lea.vmem %s1566_s6, 1024  ;;  %p2113_p11 = scmp.lt.s32.totalorder %s1566_s6, %s1566_s6 }
 0x165   :  { %v854_v25 = vrot.slane %v852_v7, 7  ;;  %v922_v49 = vrot.slane %v855_v28, 1  ;;  %v789_v33 = vadd.f32 %v2433_v12, %v766_v36  ;;  %v1816_v47 = vadd.f32 %v1815_v6, %v1814_v59  ;;  %v1817_v18 = vpop.f32.mrb[30].mxu0  ;;  %p2109_p10 = scmp.ne.s32.totalorder %s1566_s6, %s2108_s21  ;;  %p2114_p12 = scmp.lt.s32.totalorder %s2108_s21, %s2108_s21 }
 0x166   :  { %v804_v34 = vmax.f32 %v788_v13, 0.0  ;;  %v1818_v21 = vpop.f32.mrb[31].mxu0 }
 0x167   :  { %v857_v35 = vor.u32 %v855_v28, %v854_v25  ;;  %v923_v37 = vor.u32 %v922_v49, %v852_v7  ;;  %v805_v38 = vmax.f32 %v789_v33, 0.0  ;;  %v740_v8 = vadd.f32 %v2464_v29, %v1816_v47  ;;  %p2115_p13 = por %p2114_p12, %p2113_p11 }
 0x168   :  { %v1819_v42 = vadd.f32 %v1818_v21, %v1817_v18  ;;  %v1673_v49 = vunpack.c.h.bf16 %v1671_v57 }
 0x169   :  { %v896_v43 = vsel %vm2269_vm10, %v857_v35, %v2408_v24  ;;  %v952_v44 = vsel %vm2261_vm9, %v923_v37, %v2371_v3  ;;  %v814_v46 = vpack.c.bf16 %v805_v38, %v804_v34  ;;  %v767_v50 = vmul.f32 %v2428_v0, %v740_v8  ;;  %p2116_p0 = pnand %p2115_p13, %p2109_p10 }
 0x16a   :  { %897 = vst [vmem:[#allocation2 + $0x78] sm:$0xff] %v896_v43  ;;  %953 = vst [vmem:[#allocation2 + $0x88] sm:$0xff] %v952_v44  ;;  %v743_v52 = vadd.f32 %v2469_v40, %v1819_v42  ;;  %1973 = vmatmul.mubr.bf16.gmra.mrb[40].mxu0 %v952_v44 }
 0x16b   :  { %v859_v54 = vshrl.u32 %v814_v46, 16  ;;  %v862_v15 = vshll.u32 %v814_v46, 16  ;;  %1249 = vmatmul.mubr.bf16.gmra.mrb[36].mxu1 %v896_v43  ;;  %v790_v29 = vadd.f32 %v2433_v12, %v767_v50 }
 0x16c   :  { %v768_v56 = vmul.f32 %v2428_v0, %v743_v52  ;;  %1256 = vmatprep.mubr.bf16.mxu1 %v814_v46 }
 0x16d   :  { %v861_v24 = vrot.slane %v859_v54, 7  ;;  %v924_v58 = vrot.slane %v862_v15, 1  ;;  %v806_v61 = vmax.f32 %v790_v29, 0.0 }
 0x16e   :  { %v791_v3 = vadd.f32 %v2433_v12, %v768_v56 }
 0x16f   :  { %v864_v17 = vor.u32 %v862_v15, %v861_v24  ;;  %v925_v60 = vor.u32 %v924_v58, %v859_v54 }
 0x170   :  { %v807_v53 = vmax.f32 %v791_v3, 0.0 }
 0x171   :  { %v899_v40 = vsel %vm2269_vm10, %v864_v17, %v2416_v27  ;;  %v955_v41 = vsel %vm2261_vm9, %v925_v60, %v2375_v4 }
 0x172   :  { %900 = vst [vmem:[#allocation2 + $0x90] sm:$0xff] %v899_v40  ;;  %956 = vst [vmem:[#allocation2 + $0xa0] sm:$0xff] %v955_v41  ;;  %v815_v0 = vpack.c.bf16 %v807_v53, %v806_v61  ;;  %1976 = vmatprep.mubr.bf16.mxu0 %v955_v41  ;;  %v1743_v41 = vld [vmem:[#allocation3 + $0x10] sm:$0xff]  }
 0x173   :  { %1257 = vmatmul.mubr.bf16.gmra.mrb[40].mxu1 %v899_v40 }
 0x174   :  { %v866_v30 = vshrl.u32 %v815_v0, 16  ;;  %v869_v62 = vshll.u32 %v815_v0, 16  ;;  %1264 = vmatprep.mubr.bf16.mxu1 %v815_v0 }
 0x176   :  { %v868_v12 = vrot.slane %v866_v30, 7  ;;  %v926_v48 = vrot.slane %v869_v62, 1 }
 0x178   :  { %v871_v63 = vor.u32 %v869_v62, %v868_v12  ;;  %v927_v10 = vor.u32 %v926_v48, %v866_v30  ;;  %v1744_v12 = vld [vmem:[#allocation3 + $0x18] sm:$0xff]  }
 0x17a   :  { %v902_v27 = vsel %vm2269_vm10, %v871_v63, %v2422_v31  ;;  %v958_v4 = vsel %vm2261_vm9, %v927_v10, %v2391_v16  ;;  %v1742_v31 = vld [vmem:[#allocation3 + $0x8] sm:$0xff]  }
 0x17b   :  { %903 = vst [vmem:[#allocation2 + $0xa8] sm:$0xff] %v902_v27  ;;  %959 = vst [vmem:[#allocation2 + $0xb8] sm:$0xff] %v958_v4  ;;  %1265 = vmatmul.mubr.bf16.gmra.mrb[44].mxu1 %v902_v27  ;;  %1977 = vmatmul.mubr.bf16.gmra.mrb[44].mxu0 %v958_v4  ;;  %v1676_v25 = vunpack.c.l.bf16 %v1742_v31  ;;  %v1677_v21 = vunpack.c.h.bf16 %v1742_v31  ;;  %v1680_v27 = vunpack.c.l.bf16 %v1743_v41 }
 0x215   :  { %v1852_v14 = vpop.f32.mrb[16].mxu1 }
 0x216   :  { %v1853_v1 = vpop.f32.mrb[17].mxu1 }
 0x217   :  { %v1854_v2 = vadd.f32 %v1853_v1, %v1852_v14  ;;  %v1855_v39 = vpop.f32.mrb[18].mxu1 }
 0x218   :  { %v1856_v9 = vpop.f32.mrb[19].mxu1 }
 0x219   :  { %v1857_v11 = vadd.f32 %v1856_v9, %v1855_v39 }
 0x21d   :  { %v1858_v45 = vpop.f32.mrb[20].mxu1  ;;  %v1966_v32 = vpop.f32.mrb[32].mxu0 }
 0x21e   :  { %v1859_v19 = vpop.f32.mrb[21].mxu1  ;;  %v1307_v51 = vpop.f32.mrb[33].mxu0 }
 0x21f   :  { %v1860_v16 = vadd.f32 %v1859_v19, %v1858_v45  ;;  %v1308_v22 = vadd.f32 %v1854_v2, %v1307_v51  ;;  %v1861_v23 = vpop.f32.mrb[22].mxu1  ;;  %v1967_v5 = vpop.f32.mrb[34].mxu0  ;;  %v1681_v45 = vunpack.c.h.bf16 %v1743_v41 }
 0x220   :  { %v1862_v7 = vpop.f32.mrb[23].mxu1  ;;  %v1310_v28 = vpop.f32.mrb[35].mxu0 }
 0x221   :  { %v1316_v36 = vadd.f32 %v1966_v32, %v1860_v16  ;;  %v1377_v59 = vmul.f32 %v2548_v55, %v1308_v22  ;;  %v1863_v13 = vadd.f32 %v1862_v7, %v1861_v23  ;;  %v1311_v6 = vadd.f32 %v1857_v11, %v1310_v28 }
 0x222   :  { %v1684_v11 = vunpack.c.l.bf16 %v1744_v12  ;;  %v1685_v16 = vunpack.c.h.bf16 %v1744_v12 }
 0x223   :  { %v1379_v33 = vmul.f32 %v2548_v55, %v1316_v36  ;;  %v1400_v47 = vadd.f32 %v2553_v26, %v1377_v59  ;;  %v1319_v18 = vadd.f32 %v1967_v5, %v1863_v13  ;;  %v1378_v34 = vmul.f32 %v2548_v55, %v1311_v6 }
 0x225   :  { %v1402_v35 = vadd.f32 %v2553_v26, %v1379_v33  ;;  %v1448_v37 = vadd.f32 %v1672_v20, %v1400_v47  ;;  %v1380_v38 = vmul.f32 %v2548_v55, %v1319_v18  ;;  %v1401_v8 = vadd.f32 %v2553_v26, %v1378_v34  ;;  %v1864_v42 = vpop.f32.mrb[24].mxu1 }
 0x226   :  { %v1865_v43 = vpop.f32.mrb[25].mxu1 }
 0x227   :  { %v1450_v44 = vadd.f32 %v1676_v25, %v1402_v35  ;;  %v1403_v46 = vadd.f32 %v2553_v26, %v1380_v38  ;;  %v1449_v50 = vadd.f32 %v1673_v49, %v1401_v8  ;;  %v1867_v52 = vpop.f32.mrb[26].mxu1  ;;  %v1866_v54 = vadd.f32 %v1865_v43, %v1864_v42  ;;  %v1745_v43 = vld [vmem:[#allocation3 + $0x20] sm:$0xff]  }
 0x228   :  { %v1868_v15 = vpop.f32.mrb[27].mxu1  ;;  %v1464_v29 = vmax.f32 %v1448_v37, 0.0 }
 0x229   :  { %v1451_v56 = vadd.f32 %v1677_v21, %v1403_v46  ;;  %v1465_v24 = vmax.f32 %v1449_v50, 0.0  ;;  %v1869_v58 = vadd.f32 %v1868_v15, %v1867_v52  ;;  %v1466_v3 = vmax.f32 %v1450_v44, 0.0 }
 0x22b   :  { %v1467_v17 = vmax.f32 %v1451_v56, 0.0  ;;  %v1705_v60 = vpack.c.bf16 %v1465_v24, %v1464_v29  ;;  %v1746_v29 = vld [vmem:[#allocation3 + $0x28] sm:$0xff]   ;;  %v1688_v24 = vunpack.c.l.bf16 %v1745_v43 }
 0x22d   :  { %v1710_v61 = vpack.c.bf16 %v1467_v17, %v1466_v3  ;;  %1706 = vst [vmem:[#allocation9] sm:$0xff] %v1705_v60  }
 0x22e   :  { %v1870_v53 = vpop.f32.mrb[28].mxu1 }
 0x22f   :  { %v1970_v40 = vpop.f32.mrb[36].mxu0  ;;  %1749 = vst [vmem:[#allocation9 + $0x8] sm:$0xff] %v1710_v61   ;;  %v1871_v0 = vpop.f32.mrb[29].mxu1 }
 0x230   :  { %v1323_v30 = vpop.f32.mrb[37].mxu0  ;;  %v1872_v62 = vadd.f32 %v1871_v0, %v1870_v53  ;;  %v1873_v63 = vpop.f32.mrb[30].mxu1  ;;  %v1692_v0 = vunpack.c.l.bf16 %v1746_v29 }
 0x231   :  { %v1324_v48 = vadd.f32 %v1866_v54, %v1323_v30  ;;  %v1971_v10 = vpop.f32.mrb[38].mxu0  ;;  %v1874_v4 = vpop.f32.mrb[31].mxu1 }
 0x232   :  { %v1326_v14 = vpop.f32.mrb[39].mxu0  ;;  %v1332_v1 = vadd.f32 %v1970_v40, %v1872_v62  ;;  %v1875_v39 = vadd.f32 %v1874_v4, %v1873_v63  ;;  %v1689_v40 = vunpack.c.h.bf16 %v1745_v43 }
 0x233   :  { %v1381_v2 = vmul.f32 %v2548_v55, %v1324_v48  ;;  %v1327_v9 = vadd.f32 %v1869_v58, %v1326_v14 }
 0x234   :  { %v1383_v32 = vmul.f32 %v2548_v55, %v1332_v1  ;;  %v1335_v19 = vadd.f32 %v1971_v10, %v1875_v39  ;;  %v1693_v10 = vunpack.c.h.bf16 %v1746_v29 }
 0x235   :  { %v1404_v57 = vadd.f32 %v2553_v26, %v1381_v2  ;;  %v1382_v51 = vmul.f32 %v2548_v55, %v1327_v9 }
 0x236   :  { %v1406_v31 = vadd.f32 %v2553_v26, %v1383_v32  ;;  %v1384_v23 = vmul.f32 %v2548_v55, %v1335_v19  ;;  %v1876_v20 = vpop.f32.mrb[32].mxu1 }
 0x237   :  { %v1452_v22 = vadd.f32 %v1680_v27, %v1404_v57  ;;  %v1405_v5 = vadd.f32 %v2553_v26, %v1382_v51  ;;  %v1877_v7 = vpop.f32.mrb[33].mxu1 }
 0x238   :  { %v1454_v28 = vadd.f32 %v1684_v11, %v1406_v31  ;;  %v1407_v36 = vadd.f32 %v2553_v26, %v1384_v23  ;;  %v1879_v13 = vpop.f32.mrb[34].mxu1  ;;  %v1878_v6 = vadd.f32 %v1877_v7, %v1876_v20  ;;  %v1747_v20 = vld [vmem:[#allocation3 + $0x30] sm:$0xff]  }
 0x239   :  { %v1453_v59 = vadd.f32 %v1681_v45, %v1405_v5  ;;  %v1880_v25 = vpop.f32.mrb[35].mxu1  ;;  %v1468_v49 = vmax.f32 %v1452_v22, 0.0 }
 0x23a   :  { %v1455_v33 = vadd.f32 %v1685_v16, %v1407_v36  ;;  %v1881_v18 = vadd.f32 %v1880_v25, %v1879_v13  ;;  %v1470_v34 = vmax.f32 %v1454_v28, 0.0 }
 0x23b   :  { %v1469_v47 = vmax.f32 %v1453_v59, 0.0  ;;  %v1748_v59 = vld [vmem:[#allocation3 + $0x38] sm:$0xff]  }
 0x23c   :  { %v1471_v21 = vmax.f32 %v1455_v33, 0.0 }
 0x23d   :  { %v1715_v35 = vpack.c.bf16 %v1469_v47, %v1468_v49  ;;  %v1974_v37 = vpop.f32.mrb[40].mxu0  ;;  %v1696_v49 = vunpack.c.l.bf16 %v1747_v20 }
 0x23e   :  { %v1720_v38 = vpack.c.bf16 %v1471_v21, %v1470_v34  ;;  %v1882_v8 = vpop.f32.mrb[36].mxu1  ;;  %v1339_v42 = vpop.f32.mrb[41].mxu0 }
 0x23f   :  { %1750 = vst [vmem:[#allocation9 + $0x10] sm:$0xff] %v1715_v35   ;;  %v1883_v44 = vpop.f32.mrb[37].mxu1  ;;  %v1340_v46 = vadd.f32 %v1878_v6, %v1339_v42  ;;  %v1975_v50 = vpop.f32.mrb[42].mxu0 }
 0x240   :  { %1751 = vst [vmem:[#allocation9 + $0x18] sm:$0xff] %v1720_v38   ;;  %v1884_v52 = vadd.f32 %v1883_v44, %v1882_v8  ;;  %v1885_v54 = vpop.f32.mrb[38].mxu1  ;;  %v1342_v15 = vpop.f32.mrb[43].mxu0  ;;  %v1697_v38 = vunpack.c.h.bf16 %v1747_v20 }
 0x241   :  { %v1385_v56 = vmul.f32 %v2548_v55, %v1340_v46  ;;  %v1886_v58 = vpop.f32.mrb[39].mxu1  ;;  %v1343_v3 = vadd.f32 %v1881_v18, %v1342_v15  ;;  %v1701_v46 = vunpack.c.h.bf16 %v1748_v59 }
 0x242   :  { %v1348_v17 = vadd.f32 %v1974_v37, %v1884_v52  ;;  %v1887_v60 = vadd.f32 %v1886_v58, %v1885_v54  ;;  %v1700_v37 = vunpack.c.l.bf16 %v1748_v59 }
 0x243   :  { %v1408_v61 = vadd.f32 %v2553_v26, %v1385_v56  ;;  %v1386_v53 = vmul.f32 %v2548_v55, %v1343_v3 }
 0x244   :  { %v1387_v41 = vmul.f32 %v2548_v55, %v1348_v17  ;;  %v1351_v30 = vadd.f32 %v1975_v50, %v1887_v60 }
 0x245   :  { %v1456_v62 = vadd.f32 %v1688_v24, %v1408_v61  ;;  %v1409_v12 = vadd.f32 %v2553_v26, %v1386_v53 }
 0x246   :  { %v1410_v48 = vadd.f32 %v2553_v26, %v1387_v41  ;;  %v1388_v63 = vmul.f32 %v2548_v55, %v1351_v30  ;;  %v1888_v27 = vpop.f32.mrb[40].mxu1 }
 0x247   :  { %v1457_v4 = vadd.f32 %v1689_v40, %v1409_v12  ;;  %v1889_v14 = vpop.f32.mrb[41].mxu1  ;;  %v1472_v11 = vmax.f32 %v1456_v62, 0.0 }
 0x248   :  { %v1458_v1 = vadd.f32 %v1692_v0, %v1410_v48  ;;  %v1411_v2 = vadd.f32 %v2553_v26, %v1388_v63  ;;  %v1890_v39 = vadd.f32 %v1889_v14, %v1888_v27  ;;  %v1891_v9 = vpop.f32.mrb[42].mxu1 }
 0x249   :  { %v1473_v45 = vmax.f32 %v1457_v4, 0.0  ;;  %v1892_v32 = vpop.f32.mrb[43].mxu1 }
 0x24a   :  { %v1459_v57 = vadd.f32 %v1693_v10, %v1411_v2  ;;  %v1893_v19 = vadd.f32 %v1892_v32, %v1891_v9  ;;  %v1474_v16 = vmax.f32 %v1458_v1, 0.0 }
 0x24b   :  { %v1725_v51 = vpack.c.bf16 %v1473_v45, %v1472_v11 }
 0x24c   :  { %v1475_v31 = vmax.f32 %v1459_v57, 0.0 }
 0x24d   :  { %1752 = vst [vmem:[#allocation9 + $0x20] sm:$0xff] %v1725_v51  }
 0x24e   :  { %v1730_v22 = vpack.c.bf16 %v1475_v31, %v1474_v16  ;;  %v1894_v23 = vpop.f32.mrb[44].mxu1  ;;  %v1978_v5 = vpop.f32.mrb[44].mxu0 }
 0x24f   :  { %v1895_v7 = vpop.f32.mrb[45].mxu1  ;;  %v1355_v28 = vpop.f32.mrb[45].mxu0 }
 0x250   :  { %1753 = vst [vmem:[#allocation9 + $0x28] sm:$0xff] %v1730_v22   ;;  %v1896_v36 = vadd.f32 %v1895_v7, %v1894_v23  ;;  %v1356_v13 = vadd.f32 %v1890_v39, %v1355_v28  ;;  %v1897_v6 = vpop.f32.mrb[46].mxu1  ;;  %v1979_v25 = vpop.f32.mrb[46].mxu0 }
 0x251   :  { %v1898_v33 = vpop.f32.mrb[47].mxu1  ;;  %v1358_v47 = vpop.f32.mrb[47].mxu0 }
 0x252   :  { %v1364_v18 = vadd.f32 %v1978_v5, %v1896_v36  ;;  %v1389_v34 = vmul.f32 %v2548_v55, %v1356_v13  ;;  %v1899_v21 = vadd.f32 %v1898_v33, %v1897_v6  ;;  %v1359_v35 = vadd.f32 %v1893_v19, %v1358_v47 }
 0x254   :  { %v1391_v8 = vmul.f32 %v2548_v55, %v1364_v18  ;;  %v1412_v42 = vadd.f32 %v2553_v26, %v1389_v34  ;;  %v1367_v43 = vadd.f32 %v1979_v25, %v1899_v21  ;;  %v1390_v44 = vmul.f32 %v2548_v55, %v1359_v35 }
 0x256   :  { %v1414_v50 = vadd.f32 %v2553_v26, %v1391_v8  ;;  %v1460_v52 = vadd.f32 %v1696_v49, %v1412_v42  ;;  %v1392_v54 = vmul.f32 %v2548_v55, %v1367_v43  ;;  %v1413_v15 = vadd.f32 %v2553_v26, %v1390_v44 }
 0x258   :  { %v1462_v29 = vadd.f32 %v1700_v37, %v1414_v50  ;;  %v1415_v56 = vadd.f32 %v2553_v26, %v1392_v54  ;;  %v1461_v24 = vadd.f32 %v1697_v38, %v1413_v15  ;;  %v1476_v58 = vmax.f32 %v1460_v52, 0.0 }
 0x25a   :  { %v1463_v3 = vadd.f32 %v1701_v46, %v1415_v56  ;;  %v1477_v17 = vmax.f32 %v1461_v24, 0.0  ;;  %v1478_v60 = vmax.f32 %v1462_v29, 0.0 }
 0x25c   :  { %v1479_v61 = vmax.f32 %v1463_v3, 0.0  ;;  %v1735_v53 = vpack.c.bf16 %v1477_v17, %v1476_v58 }
 0x25e   :  { %v1740_v40 = vpack.c.bf16 %v1479_v61, %v1478_v60  ;;  %1754 = vst [vmem:[#allocation9 + $0x30] sm:$0xff] %v1735_v53  }
 0x260   :  { %1755 = vst [vmem:[#allocation9 + $0x38] sm:$0xff] %v1740_v40  }
 0x261   :  { %2119 = shalt.err (!%p2116_p0)
}
 0x262   :  { %s2120_s24 = scalar_lea.hbm %s2609_s7, 1024 }
 0x263   :  { %p2121_p1 = scmp.ne.s32.totalorder %s2609_s7, %s2120_s24  ;;  %p2124_p2 = scmp.lt.u32.totalorder %s2120_s24, %s2609_s7 }
 0x265   :  { %p2126_p3 = pnand %p2124_p2, %p2121_p1 }
 0x267   :  { %2129 = shalt.err (!%p2126_p3)
}
 0x268   :  { %1571 = dma.vmem_to_hbm [thread:$0]  %s1566_s6, 1024, %s2609_s7, [#allocation5], %s2138_s13, %s2138_s13, %s2139_s14  }
 0x269   :  { %2134 = dma.done.wait [#allocation5], 1024  }
 0x26a   :  { %2135 = vsyncadd [#allocation5], 4294966272 }
 0x26b   :  { %1575 = vsyncpa [#allocation4], 1 }
 0x26c   :  { %1576 = vsyncpa [#allocation7], 1 }
 0x26d   :  { %1577 = vsyncpa [#allocation5], 1 }

</bundles_post_ra>
